<compile_context>
chip_gen: v6e
topology: v6e:2x2x1
jax: 0.10.0
libtpu: 0.0.40
codegen_flags: <defaults>
</compile_context>

<pallas_src>
import math

import jax
import jax.numpy as jnp
from jax.experimental import pallas as pl
from jax.experimental.pallas import tpu as pltpu


def make_pe_table(d_model: int, max_len: int = 5000, dtype=jnp.float32) -> jnp.ndarray:
    """Deterministic sinusoidal positional-encoding buffer, matching the torch __init__."""
    position = jnp.arange(0, max_len, dtype=jnp.float32)[:, None]                     # (max_len, 1)
    div_term = jnp.exp(
        jnp.arange(0, d_model, 2, dtype=jnp.float32) * (-math.log(10000.0) / d_model)
    )                                                                                  # (d_model//2,)
    pe = jnp.zeros((max_len, d_model), dtype=jnp.float32)
    pe = pe.at[:, 0::2].set(jnp.sin(position * div_term))
    pe = pe.at[:, 1::2].set(jnp.cos(position * div_term))
    return pe[:, None, :].astype(dtype)                                               # (max_len, 1, d_model)


def _pe_add_kernel(x_ref, pe_ref, o_ref):
    # Pure streaming elementwise add on lane-dense (rows, B*D) tiles.
    o_ref[...] = (x_ref[...] + pe_ref[...]).astype(o_ref.dtype)


def positional_encoding_forward(
    x: jnp.ndarray,
    pe: jnp.ndarray,
    *,
    min_pallas_elements: int = 1 << 16,
    block_rows: int | None = None,
) -> jnp.ndarray:
    """x: (seq_len, batch, d_model); pe: (max_len, 1, d_model)."""
    S, B, D = x.shape
    if S > pe.shape[0]:
        raise ValueError(f"seq_len={S} exceeds positional-encoding max_len={pe.shape[0]}")

    # Match dtypes so the kernel does a single-dtype VPU add (and halves pe DMA for bf16 x).
    pe_slice = pe[:S].astype(x.dtype)                                                 # (S, 1, D)

    # Tiny inputs: fixed pallas_call overhead dwarfs the ~KBs of traffic; let XLA fuse.
    if S * B * D < min_pallas_elements:
        return x + pe_slice

    # Lane-dense 2D layout: last dim is the full (B*D) extent, second-last is tiled rows.
    x2 = x.reshape(S, B * D)
    pe2 = jnp.broadcast_to(pe_slice, (S, B, D)).reshape(S, B * D)

    if block_rows is None:
        itemsize = jnp.dtype(x.dtype).itemsize
        row_bytes = B * D * itemsize
        # ~1 MiB per operand block; with 3 operands double-buffered that is ~6 MiB of
        # VMEM, comfortably under the scoped limits of v5e (16 MiB) and v7x (32 MiB).
        target_block_bytes = 1 << 20
        block_rows = max(8, ((target_block_bytes // max(row_bytes, 1)) // 8) * 8)
    tS = S if block_rows >= S else block_rows                                          # multiple of 8, or full S

    grid = (pl.cdiv(S, tS),)

    out2 = pl.pallas_call(
        _pe_add_kernel,
        out_shape=jax.ShapeDtypeStruct((S, B * D), x.dtype),
        grid=grid,
        in_specs=[
            pl.BlockSpec((tS, B * D), lambda i: (i, 0)),
            pl.BlockSpec((tS, B * D), lambda i: (i, 0)),
        ],
        out_specs=pl.BlockSpec((tS, B * D), lambda i: (i, 0)),
        input_output_aliases={0: 0},  # in-place elementwise add: output reuses x's buffer
        compiler_params=pltpu.CompilerParams(
            dimension_semantics=("parallel",),
        ),
    )(x2, pe2)

    # Dropout: eval-mode (identity). See TODO(synk) above.
    return out2.reshape(S, B, D)


if __name__ == "__main__":
    # --- small smoke test (forces the Pallas path despite the tiny size) ---
    seq_len, batch, d_model = 8, 2, 32
    max_len = 64

    key = jax.random.PRNGKey(0)
    x = jax.random.normal(key, (seq_len, batch, d_model), dtype=jnp.float32)
    pe = make_pe_table(d_model, max_len=max_len)

    ref = x + pe[:seq_len]  # reference computed before the (aliased) kernel call

    fwd_small = jax.jit(lambda a, p: positional_encoding_forward(a, p, min_pallas_elements=0))
    out = jax.block_until_ready(fwd_small(x, pe))
    assert out.shape == (seq_len, batch, d_model)
    assert jnp.allclose(out, ref, atol=1e-6), "kernel output mismatch vs reference (small)"

    # --- larger lane-dense shape exercising the multi-block pipelined grid ---
    S2, B2, D2 = 512, 4, 128
    x2 = jax.random.normal(jax.random.PRNGKey(1), (S2, B2, D2), dtype=jnp.float32)
    pe2 = make_pe_table(D2, max_len=1024)
    ref2 = x2 + pe2[:S2]

    fwd_big = jax.jit(lambda a, p: positional_encoding_forward(a, p, block_rows=128))
    out2 = jax.block_until_ready(fwd_big(x2, pe2))
    assert out2.shape == (S2, B2, D2)
    assert jnp.allclose(out2, ref2, atol=1e-6), "kernel output mismatch vs reference (tiled)"

    print("KERNEL_OK")
</pallas_src>

<mosaic_0001>
module attributes {stable_mosaic.version = 11 : i64} {
  func.func @_pe_add_kernel(%arg0: i32, %arg1: memref<8x64xf32, #tpu.memory_space<vmem>>, %arg2: memref<8x64xf32, #tpu.memory_space<vmem>>, %arg3: memref<8x64xf32, #tpu.memory_space<vmem>>) attributes {dimension_semantics = [#tpu.dimension_semantics<parallel>], iteration_bounds = array<i64: 1>, scalar_prefetch = 0 : i64, scratch_operands = 0 : i64, tpu.core_type = #tpu.core_type<tc>, window_params = [{transform_indices = @transform_0, window_bounds = array<i64: 8, 64>}, {transform_indices = @transform_1, window_bounds = array<i64: 8, 64>}, {transform_indices = @transform_2, window_bounds = array<i64: 8, 64>}]} {
    %c0 = arith.constant 0 : index
    %c0_0 = arith.constant 0 : index
    %0 = vector.load %arg1[%c0, %c0_0] : memref<8x64xf32, #tpu.memory_space<vmem>>, vector<8x64xf32>
    %c0_1 = arith.constant 0 : index
    %c0_2 = arith.constant 0 : index
    %1 = vector.load %arg2[%c0_1, %c0_2] : memref<8x64xf32, #tpu.memory_space<vmem>>, vector<8x64xf32>
    %2 = arith.addf %0, %1 : vector<8x64xf32>
    %c0_3 = arith.constant 0 : index
    %c0_4 = arith.constant 0 : index
    %3 = vector.load %arg3[%c0_3, %c0_4] : memref<8x64xf32, #tpu.memory_space<vmem>>, vector<8x64xf32>
    tpu.vector_store %arg3[%c0_3, %c0_4], %2 {strides = array<i32>} : memref<8x64xf32, #tpu.memory_space<vmem>>, vector<8x64xf32>,
    return
  }
  func.func @transform_0(%arg0: i32) -> (i32, i32) {
    %c0_i32 = arith.constant 0 : i32
    %c0_i32_0 = arith.constant 0 : i32
    return %arg0, %c0_i32 : i32, i32
  }
  func.func @transform_1(%arg0: i32) -> (i32, i32) {
    %c0_i32 = arith.constant 0 : i32
    %c0_i32_0 = arith.constant 0 : i32
    return %arg0, %c0_i32 : i32, i32
  }
  func.func @transform_2(%arg0: i32) -> (i32, i32) {
    %c0_i32 = arith.constant 0 : i32
    %c0_i32_0 = arith.constant 0 : i32
    return %arg0, %c0_i32 : i32, i32
  }
}

</mosaic_0001>

<bundles_post_ra>
// kernel: _lambda_.1
= control target key start
LH: loop header
LB: loop body
LE: loop exit
PB: predicated region body
PF: predicated region fallthrough
CT: control target
= control target key end

     0   :  { %vm14_vm0 = vcmask 523264   ;;  %s44_s0 = inlined_call_operand.vmem [shape: f32[8,64], index: 0, kind: input, shape index: {}, may-alias: {0,2}]   ;;  %s45_s1 = inlined_call_operand.vmem [shape: f32[8,64], index: 1, kind: input, shape index: {}]   ;;  %s46_s2 = inlined_call_operand.vmem [shape: f32[8,64], index: 2, kind: output, shape index: {}, may-alias: {0,2}]  }
   0x1   :  { %v11_v0 = vld [vmem:[%s44_s0] sm:$0xff] }
   0x2   :  { %v12_v1 = vld [vmem:[%s45_s1] sm:$0xff] }
   0x3   :  { %v13_v2 = vadd.f32 %v12_v1, %v11_v0 }
   0x5   :  { %15 = vst.msk [vmem:[%s46_s2] sm:$0xff] %vm14_vm0, %v13_v2 }

</bundles_post_ra>
